<compile_context>
chip_gen: v5e
topology: v5e:2x2
jax: 0.10.0
libtpu: 0.0.40
codegen_flags: <defaults>
</compile_context>

<pallas_src>
import functools

import jax
import jax.numpy as jnp
from jax.experimental import pallas as pl
from jax.experimental.pallas import tpu as pltpu


def _round_up(x, m):
    return ((x + m - 1) // m) * m


def _leaky_relu(x, slope=0.1):
    return jnp.where(x >= 0, x, slope * x)


# ----------------------------------------------------------------------------
# Pallas kernel: fused 28-dim spatial features + 2-layer MLP (LeakyReLU 0.1),
# everything lane-major (pairs on the lane axis).
# ----------------------------------------------------------------------------
def _spatial_mlp_kernel(src_ref, w1t_ref, b1_ref, w2t_ref, b2_ref, o_ref, feat_ref):
    # src_ref : (10, TM) f32 rows = [x1s,y1s,x2s,y2s, x1o,y1o,x2o,y2o, W, H]
    # w1t_ref : (64, 32)   transposed Linear1, feature dim zero-padded 28 -> 32
    # b1_ref  : (64, 1)    w2t_ref: (64, 64)   b2_ref: (64, 1)
    # o_ref   : (64, TM)   transposed output (lane-dense stores)
    # feat_ref: (32, TM)   VMEM scratch for the spatial features (+4 pad rows)

    # Zero the scratch once; rows 28:32 then stay zero for every grid step,
    # rows 0:28 are overwritten below each step.
    @pl.when(pl.program_id(0) == 0)
    def _():
        feat_ref[...] = jnp.zeros_like(feat_ref)

    src = src_ref[...]
    box_s = src[0:4, :]                         # subject box   (4, TM)
    box_o = src[4:8, :]                         # object box    (4, TM)
    img_wh = src[8:10, :]                       # [W; H]        (2, TM)

    def wh_ctr(lo, hi):
        wh = hi - lo + 1.0                      # (2, TM) [w; h]
        ctr = lo + 0.5 * wh                     # (2, TM) [cx; cy]
        inv = pl.reciprocal(wh, approx=True)    # EUP slot
        return wh, ctr, inv

    wh_s, ctr_s, inv_s = wh_ctr(box_s[0:2, :], box_s[2:4, :])
    wh_o, ctr_o, inv_o = wh_ctr(box_o[0:2, :], box_o[2:4, :])
    # union box (no 4-row box materialized)
    lo_u = jnp.minimum(box_s[0:2, :], box_o[0:2, :])
    hi_u = jnp.maximum(box_s[2:4, :], box_o[2:4, :])
    wh_u, ctr_u, inv_u = wh_ctr(lo_u, hi_u)

    def pair_feat(row, ctr_a, inv_a, wh_b, ctr_b, inv_b):
        # mirrors _get_pair_feature(a, b):
        #   rows [row:+2]  = bbox_transform_inv(a, b)[:, 0:2]   (dx, dy)
        #   rows [row+2:+4]= bbox_transform_inv(a, b)[:, 2:4]   (dw, dh)
        #   rows [row+4:+6]= bbox_transform_inv(b, a)[:, 0:2]   (dx, dy)
        feat_ref[row:row + 2, :] = (ctr_b - ctr_a) * inv_a
        feat_ref[row + 2:row + 4, :] = jnp.log(wh_b * inv_a)
        feat_ref[row + 4:row + 6, :] = (ctr_a - ctr_b) * inv_b

    pair_feat(0, ctr_s, inv_s, wh_o, ctr_o, inv_o)      # f12
    pair_feat(6, ctr_s, inv_s, wh_u, ctr_u, inv_u)      # f1u
    pair_feat(12, ctr_u, inv_u, wh_o, ctr_o, inv_o)     # fu2

    inv_img = pl.reciprocal(img_wh, approx=True)        # (2, TM) [1/W; 1/H]
    inv_area = inv_img[0:1, :] * inv_img[1:2, :]         # (1, TM)

    def box_feat(row, box, wh):
        # mirrors _get_box_feature(box, W, H)
        feat_ref[row:row + 2, :] = box[0:2, :] * inv_img      # x1/W, y1/H
        feat_ref[row + 2:row + 4, :] = box[2:4, :] * inv_img  # x2/W, y2/H
        feat_ref[row + 4:row + 5, :] = wh[0:1, :] * wh[1:2, :] * inv_area

    box_feat(18, box_s, wh_s)                             # f1
    box_feat(23, box_o, wh_o)                             # f2

    # Lanes-stay-lanes MLP: two MXU matmuls with f32 accumulation, no transpose.
    feat = feat_ref[...]                                  # (32, TM)
    h = jnp.dot(w1t_ref[...], feat, preferred_element_type=jnp.float32)
    h = _leaky_relu(h + b1_ref[...])
    y = jnp.dot(w2t_ref[...], h, preferred_element_type=jnp.float32)
    o_ref[...] = _leaky_relu(y + b2_ref[...])


@functools.partial(jax.jit, static_argnames=("tm",))
def _spatial_mlp_call(src, w1, b1, w2, b2, *, tm):
    d_in_pad = 32
    n = src.shape[1]
    d_out = w2.shape[1]
    # (28, 64) -> zero-pad to (32, 64) -> transpose to (64, 32); biases -> (64, 1).
    # Transposing/padding the tiny weights in the wrapper is free.
    w1t = jnp.concatenate(
        [w1, jnp.zeros((d_in_pad - w1.shape[0], w1.shape[1]), w1.dtype)], axis=0).T
    w2t = w2.T
    b1c = b1.reshape(-1, 1)
    b2c = b2.reshape(-1, 1)

    cost = pl.CostEstimate(
        flops=2 * n * (d_in_pad * d_out + d_out * d_out),
        transcendentals=15 * n,        # 6 logs + ~9 approx reciprocals per pair
        bytes_accessed=n * 4 * (10 + d_out)
        + 4 * (d_in_pad * d_out + d_out + d_out * d_out + d_out),
    )
    return pl.pallas_call(
        _spatial_mlp_kernel,
        out_shape=jax.ShapeDtypeStruct((d_out, n), jnp.float32),
        grid_spec=pltpu.PrefetchScalarGridSpec(
            num_scalar_prefetch=0,
            grid=(pl.cdiv(n, tm),),
            in_specs=[
                pl.BlockSpec((10, tm), lambda i: (0, i)),
                pl.BlockSpec((d_out, d_in_pad), lambda i: (0, 0)),
                pl.BlockSpec((d_out, 1), lambda i: (0, 0)),
                pl.BlockSpec((d_out, d_out), lambda i: (0, 0)),
                pl.BlockSpec((d_out, 1), lambda i: (0, 0)),
            ],
            out_specs=pl.BlockSpec((d_out, tm), lambda i: (0, i)),
            scratch_shapes=[pltpu.VMEM((d_in_pad, tm), jnp.float32)],
        ),
        compiler_params=pltpu.CompilerParams(
            dimension_semantics=("parallel",),
        ),
        cost_estimate=cost,
    )(src, w1t, b1c, w2t, b2c)


# ----------------------------------------------------------------------------
# Tile / bucket selection.
# ----------------------------------------------------------------------------
_MAX_TILE = 2048


def _bucket_n(n):
    # Bucket N to limit distinct traced shapes (each distinct (N, tile)
    # retraces/recompiles).
    n = max(n, 1)
    if n <= 512:
        return _round_up(n, 128)
    return _round_up(n, 512)


def _choose_tile(n_pad):
    # Biggest tile that amortizes the ~0.35 us per-grid-step overhead; for
    # large N cap it so the grid keeps >= 2 "parallel" steps, letting megacore
    # chips (v7x, 2 TensorCores) shard the axis.  VMEM is trivial either way.
    if n_pad <= _MAX_TILE:
        return n_pad
    return min(_MAX_TILE, _round_up(pl.cdiv(n_pad, 2), 128))


# ----------------------------------------------------------------------------
# Full SpatialFeature.forward equivalent.
# ----------------------------------------------------------------------------
def spatial_feature_forward(proposal_pairs, params):
    """proposal_pairs: list of (bbox (Ni, 8), (width, height)) -> (sum Ni, 64) f32."""
    pieces = []
    for bbox, (width, height) in proposal_pairs:
        bbox_t = jnp.asarray(bbox, jnp.float32).T                       # (8, Ni)
        ni = bbox_t.shape[1]
        wh = jnp.stack([jnp.full((ni,), width, jnp.float32),
                        jnp.full((ni,), height, jnp.float32)], axis=0)  # (2, Ni)
        pieces.append(jnp.concatenate([bbox_t, wh], axis=0))            # (10, Ni)
    src = jnp.concatenate(pieces, axis=1)                               # (10, N)
    n = src.shape[1]

    n_pad = _bucket_n(n)
    if n_pad != n:
        # Safe filler (unit boxes, W=H=1): padded lanes stay finite, are
        # lane-local through the whole kernel, and are sliced away below.
        filler = jnp.array([0., 0., 1., 1., 0., 0., 1., 1., 1., 1.],
                           jnp.float32)[:, None]
        src = jnp.concatenate(
            [src, jnp.broadcast_to(filler, (10, n_pad - n))], axis=1)

    tile = _choose_tile(n_pad)
    out_t = _spatial_mlp_call(src, params["w1"], params["b1"],
                              params["w2"], params["b2"], tm=tile)      # (64, n_pad)
    # One cheap XLA transpose back to the module's (N, 64) layout; the in-kernel
    # lane-dense-store win dominates.  Consumers that accept (64, N) can skip it.
    return out_t[:, :n].T


def init_params(key):
    # Deterministic init mimicking nn.Linear default (uniform +- 1/sqrt(fan_in)).
    k1, k2, k3, k4 = jax.random.split(key, 4)
    lim1 = 1.0 / jnp.sqrt(28.0)
    lim2 = 1.0 / jnp.sqrt(64.0)
    return {
        "w1": jax.random.uniform(k1, (28, 64), jnp.float32, -lim1, lim1),
        "b1": jax.random.uniform(k2, (1, 64), jnp.float32, -lim1, lim1),
        "w2": jax.random.uniform(k3, (64, 64), jnp.float32, -lim2, lim2),
        "b2": jax.random.uniform(k4, (1, 64), jnp.float32, -lim2, lim2),
    }


# ----------------------------------------------------------------------------
# Pure-JAX reference (mirrors the numpy code) for a correctness check.
# ----------------------------------------------------------------------------
def _bbox_transform_inv(boxes, gt_boxes):
    ex_w = boxes[:, 2] - boxes[:, 0] + 1.0
    ex_h = boxes[:, 3] - boxes[:, 1] + 1.0
    ex_cx = boxes[:, 0] + 0.5 * ex_w
    ex_cy = boxes[:, 1] + 0.5 * ex_h
    gt_w = gt_boxes[:, 2] - gt_boxes[:, 0] + 1.0
    gt_h = gt_boxes[:, 3] - gt_boxes[:, 1] + 1.0
    gt_cx = gt_boxes[:, 0] + 0.5 * gt_w
    gt_cy = gt_boxes[:, 1] + 0.5 * gt_h
    dx = (gt_cx - ex_cx) / ex_w
    dy = (gt_cy - ex_cy) / ex_h
    dw = jnp.log(gt_w / ex_w)
    dh = jnp.log(gt_h / ex_h)
    return jnp.stack([dx, dy, dw, dh], axis=1)


def _boxes_union(b1, b2):
    return jnp.stack([jnp.minimum(b1[:, 0], b2[:, 0]),
                      jnp.minimum(b1[:, 1], b2[:, 1]),
                      jnp.maximum(b1[:, 2], b2[:, 2]),
                      jnp.maximum(b1[:, 3], b2[:, 3])], axis=1)


def _get_pair_feature(b1, b2):
    d1 = _bbox_transform_inv(b1, b2)
    d2 = _bbox_transform_inv(b2, b1)
    return jnp.concatenate([d1, d2[:, :2]], axis=1)


def _get_box_feature(boxes, width, height):
    f1 = boxes[:, 0] / width
    f2 = boxes[:, 1] / height
    f3 = boxes[:, 2] / width
    f4 = boxes[:, 3] / height
    f5 = (boxes[:, 2] - boxes[:, 0] + 1.0) * (boxes[:, 3] - boxes[:, 1] + 1.0) / (width * height)
    return jnp.stack([f1, f2, f3, f4, f5], axis=1)


def _get_spt_features(boxes1, boxes2, width, height):
    boxes_u = _boxes_union(boxes1, boxes2)
    return jnp.concatenate([_get_pair_feature(boxes1, boxes2),
                            _get_pair_feature(boxes1, boxes_u),
                            _get_pair_feature(boxes_u, boxes2),
                            _get_box_feature(boxes1, width, height),
                            _get_box_feature(boxes2, width, height)], axis=1)


def _reference_forward(proposal_pairs, params):
    feats = []
    for bbox, (width, height) in proposal_pairs:
        bbox = jnp.asarray(bbox, jnp.float32)
        feats.append(_get_spt_features(bbox[:, :4], bbox[:, 4:],
                                       jnp.float32(width), jnp.float32(height)))
    x = jnp.concatenate(feats, axis=0)
    hp = jax.lax.Precision.HIGHEST
    h = _leaky_relu(jnp.dot(x, params["w1"], precision=hp) + params["b1"])
    return _leaky_relu(jnp.dot(h, params["w2"], precision=hp) + params["b2"])


def _make_boxes(key, n, width, height):
    """Random valid boxes packed as (N, 8) = [subj(4), obj(4)]."""
    kx, ky, kw, kh = jax.random.split(key, 4)
    x1 = jax.random.uniform(kx, (n, 2), jnp.float32, 0.0, width * 0.6)
    y1 = jax.random.uniform(ky, (n, 2), jnp.float32, 0.0, height * 0.6)
    bw = jax.random.uniform(kw, (n, 2), jnp.float32, 4.0, width * 0.35)
    bh = jax.random.uniform(kh, (n, 2), jnp.float32, 4.0, height * 0.35)
    subj = jnp.stack([x1[:, 0], y1[:, 0], x1[:, 0] + bw[:, 0], y1[:, 0] + bh[:, 0]], 1)
    obj = jnp.stack([x1[:, 1], y1[:, 1], x1[:, 1] + bw[:, 1], y1[:, 1] + bh[:, 1]], 1)
    return jnp.concatenate([subj, obj], axis=1)


if __name__ == "__main__":
    key = jax.random.PRNGKey(0)
    kp, kb1, kb2 = jax.random.split(key, 3)

    params = init_params(kp)

    # Two "images", each with a handful of proposal pairs.
    width, height = 64.0, 48.0
    proposal_pairs = [
        (_make_boxes(kb1, 6, width, height), (width, height)),
        (_make_boxes(kb2, 10, width, height), (width, height)),
    ]

    out = spatial_feature_forward(proposal_pairs, params)
    out = jax.block_until_ready(out)

    assert out.shape == (16, 64), out.shape
    assert out.dtype == jnp.float32
    assert bool(jnp.all(jnp.isfinite(out)))

    ref = jax.block_until_ready(_reference_forward(proposal_pairs, params))
    assert bool(jnp.allclose(out, ref, rtol=2e-2, atol=2e-2)), float(
        jnp.max(jnp.abs(out - ref)))

    print("KERNEL_OK")
</pallas_src>

<mosaic_0001>
module attributes {stable_mosaic.version = 11 : i64} {
  func.func @_spatial_mlp_kernel(%arg0: i32, %arg1: memref<10x128xf32, #tpu.memory_space<vmem>>, %arg2: memref<64x32xf32, #tpu.memory_space<vmem>>, %arg3: memref<64x1xf32, #tpu.memory_space<vmem>>, %arg4: memref<64x64xf32, #tpu.memory_space<vmem>>, %arg5: memref<64x1xf32, #tpu.memory_space<vmem>>, %arg6: memref<64x128xf32, #tpu.memory_space<vmem>>, %arg7: memref<32x128xf32, #tpu.memory_space<vmem>>) attributes {dimension_semantics = [#tpu.dimension_semantics<parallel>], iteration_bounds = array<i64: 1>, scalar_prefetch = 0 : i64, scratch_operands = 1 : i64, tpu.core_type = #tpu.core_type<tc>, window_params = [{transform_indices = @transform_0, window_bounds = array<i64: 10, 128>}, {pipeline_mode = #tpu.pipeline_mode<synchronous>, transform_indices = @transform_1, window_bounds = array<i64: 64, 32>}, {pipeline_mode = #tpu.pipeline_mode<synchronous>, transform_indices = @transform_2, window_bounds = array<i64: 64, 1>}, {pipeline_mode = #tpu.pipeline_mode<synchronous>, transform_indices = @transform_3, window_bounds = array<i64: 64, 64>}, {pipeline_mode = #tpu.pipeline_mode<synchronous>, transform_indices = @transform_4, window_bounds = array<i64: 64, 1>}, {transform_indices = @transform_5, window_bounds = array<i64: 64, 128>}]} {
    %c0_i32 = arith.constant 0 : i32
    %0 = arith.cmpi eq, %arg0, %c0_i32 : i32
    %1 = arith.extui %0 : i1 to i32
    %c0_i32_0 = arith.constant 0 : i32
    %2 = arith.cmpi ne, %1, %c0_i32_0 : i32
    scf.if %2 {
      %cst_41 = arith.constant 0.000000e+00 : f32
      %113 = vector.broadcast %cst_41 : f32 to vector<32x128xf32>
      %c0_42 = arith.constant 0 : index
      %c0_43 = arith.constant 0 : index
      %114 = vector.load %arg7[%c0_42, %c0_43] : memref<32x128xf32, #tpu.memory_space<vmem>>, vector<32x128xf32>
      tpu.vector_store %arg7[%c0_42, %c0_43], %113 {strides = array<i32>} : memref<32x128xf32, #tpu.memory_space<vmem>>, vector<32x128xf32>,
    } else {
    }
    %c0 = arith.constant 0 : index
    %c0_1 = arith.constant 0 : index
    %3 = vector.load %arg1[%c0, %c0_1] : memref<10x128xf32, #tpu.memory_space<vmem>>, vector<10x128xf32>
    %4 = vector.extract_strided_slice %3 {offsets = [0, 0], sizes = [4, 128], strides = [1, 1]} : vector<10x128xf32> to vector<4x128xf32>
    %5 = vector.extract_strided_slice %3 {offsets = [4, 0], sizes = [4, 128], strides = [1, 1]} : vector<10x128xf32> to vector<4x128xf32>
    %6 = vector.extract_strided_slice %3 {offsets = [8, 0], sizes = [2, 128], strides = [1, 1]} : vector<10x128xf32> to vector<2x128xf32>
    %7 = vector.extract_strided_slice %4 {offsets = [0, 0], sizes = [2, 128], strides = [1, 1]} : vector<4x128xf32> to vector<2x128xf32>
    %8 = vector.extract_strided_slice %4 {offsets = [2, 0], sizes = [2, 128], strides = [1, 1]} : vector<4x128xf32> to vector<2x128xf32>
    %9 = arith.subf %8, %7 : vector<2x128xf32>
    %cst = arith.constant 1.000000e+00 : f32
    %10 = vector.broadcast %cst : f32 to vector<2x128xf32>
    %11 = arith.addf %9, %10 : vector<2x128xf32>
    %cst_2 = arith.constant 5.000000e-01 : f32
    %12 = vector.broadcast %cst_2 : f32 to vector<2x128xf32>
    %13 = arith.mulf %12, %11 : vector<2x128xf32>
    %14 = arith.addf %7, %13 : vector<2x128xf32>
    %15 = tpu.reciprocal %11 {approx = true} : vector<2x128xf32> -> vector<2x128xf32>
    %16 = vector.extract_strided_slice %5 {offsets = [0, 0], sizes = [2, 128], strides = [1, 1]} : vector<4x128xf32> to vector<2x128xf32>
    %17 = vector.extract_strided_slice %5 {offsets = [2, 0], sizes = [2, 128], strides = [1, 1]} : vector<4x128xf32> to vector<2x128xf32>
    %18 = arith.subf %17, %16 : vector<2x128xf32>
    %cst_3 = arith.constant 1.000000e+00 : f32
    %19 = vector.broadcast %cst_3 : f32 to vector<2x128xf32>
    %20 = arith.addf %18, %19 : vector<2x128xf32>
    %cst_4 = arith.constant 5.000000e-01 : f32
    %21 = vector.broadcast %cst_4 : f32 to vector<2x128xf32>
    %22 = arith.mulf %21, %20 : vector<2x128xf32>
    %23 = arith.addf %16, %22 : vector<2x128xf32>
    %24 = tpu.reciprocal %20 {approx = true} : vector<2x128xf32> -> vector<2x128xf32>
    %25 = vector.extract_strided_slice %4 {offsets = [0, 0], sizes = [2, 128], strides = [1, 1]} : vector<4x128xf32> to vector<2x128xf32>
    %26 = vector.extract_strided_slice %5 {offsets = [0, 0], sizes = [2, 128], strides = [1, 1]} : vector<4x128xf32> to vector<2x128xf32>
    %27 = arith.minimumf %25, %26 : vector<2x128xf32>
    %28 = vector.extract_strided_slice %4 {offsets = [2, 0], sizes = [2, 128], strides = [1, 1]} : vector<4x128xf32> to vector<2x128xf32>
    %29 = vector.extract_strided_slice %5 {offsets = [2, 0], sizes = [2, 128], strides = [1, 1]} : vector<4x128xf32> to vector<2x128xf32>
    %30 = arith.maximumf %28, %29 : vector<2x128xf32>
    %31 = arith.subf %30, %27 : vector<2x128xf32>
    %cst_5 = arith.constant 1.000000e+00 : f32
    %32 = vector.broadcast %cst_5 : f32 to vector<2x128xf32>
    %33 = arith.addf %31, %32 : vector<2x128xf32>
    %cst_6 = arith.constant 5.000000e-01 : f32
    %34 = vector.broadcast %cst_6 : f32 to vector<2x128xf32>
    %35 = arith.mulf %34, %33 : vector<2x128xf32>
    %36 = arith.addf %27, %35 : vector<2x128xf32>
    %37 = tpu.reciprocal %33 {approx = true} : vector<2x128xf32> -> vector<2x128xf32>
    %38 = arith.subf %23, %14 : vector<2x128xf32>
    %39 = arith.mulf %38, %15 : vector<2x128xf32>
    %c0_7 = arith.constant 0 : index
    %c0_8 = arith.constant 0 : index
    %40 = vector.load %arg7[%c0_7, %c0_8] : memref<32x128xf32, #tpu.memory_space<vmem>>, vector<2x128xf32>
    tpu.vector_store %arg7[%c0_7, %c0_8], %39 {strides = array<i32>} : memref<32x128xf32, #tpu.memory_space<vmem>>, vector<2x128xf32>,
    %41 = arith.mulf %20, %15 : vector<2x128xf32>
    %42 = math.log %41 : vector<2x128xf32>
    %c2 = arith.constant 2 : index
    %c0_9 = arith.constant 0 : index
    %43 = vector.load %arg7[%c2, %c0_9] : memref<32x128xf32, #tpu.memory_space<vmem>>, vector<2x128xf32>
    tpu.vector_store %arg7[%c2, %c0_9], %42 {strides = array<i32>} : memref<32x128xf32, #tpu.memory_space<vmem>>, vector<2x128xf32>,
    %44 = arith.subf %14, %23 : vector<2x128xf32>
    %45 = arith.mulf %44, %24 : vector<2x128xf32>
    %c4 = arith.constant 4 : index
    %c0_10 = arith.constant 0 : index
    %46 = vector.load %arg7[%c4, %c0_10] : memref<32x128xf32, #tpu.memory_space<vmem>>, vector<2x128xf32>
    tpu.vector_store %arg7[%c4, %c0_10], %45 {strides = array<i32>} : memref<32x128xf32, #tpu.memory_space<vmem>>, vector<2x128xf32>,
    %47 = arith.subf %36, %14 : vector<2x128xf32>
    %48 = arith.mulf %47, %15 : vector<2x128xf32>
    %c6 = arith.constant 6 : index
    %c0_11 = arith.constant 0 : index
    %49 = vector.load %arg7[%c6, %c0_11] : memref<32x128xf32, #tpu.memory_space<vmem>>, vector<2x128xf32>
    tpu.vector_store %arg7[%c6, %c0_11], %48 {strides = array<i32>} : memref<32x128xf32, #tpu.memory_space<vmem>>, vector<2x128xf32>,
    %50 = arith.mulf %33, %15 : vector<2x128xf32>
    %51 = math.log %50 : vector<2x128xf32>
    %c8 = arith.constant 8 : index
    %c0_12 = arith.constant 0 : index
    %52 = vector.load %arg7[%c8, %c0_12] : memref<32x128xf32, #tpu.memory_space<vmem>>, vector<2x128xf32>
    tpu.vector_store %arg7[%c8, %c0_12], %51 {strides = array<i32>} : memref<32x128xf32, #tpu.memory_space<vmem>>, vector<2x128xf32>,
    %53 = arith.subf %14, %36 : vector<2x128xf32>
    %54 = arith.mulf %53, %37 : vector<2x128xf32>
    %c10 = arith.constant 10 : index
    %c0_13 = arith.constant 0 : index
    %55 = vector.load %arg7[%c10, %c0_13] : memref<32x128xf32, #tpu.memory_space<vmem>>, vector<2x128xf32>
    tpu.vector_store %arg7[%c10, %c0_13], %54 {strides = array<i32>} : memref<32x128xf32, #tpu.memory_space<vmem>>, vector<2x128xf32>,
    %56 = arith.subf %23, %36 : vector<2x128xf32>
    %57 = arith.mulf %56, %37 : vector<2x128xf32>
    %c12 = arith.constant 12 : index
    %c0_14 = arith.constant 0 : index
    %58 = vector.load %arg7[%c12, %c0_14] : memref<32x128xf32, #tpu.memory_space<vmem>>, vector<2x128xf32>
    tpu.vector_store %arg7[%c12, %c0_14], %57 {strides = array<i32>} : memref<32x128xf32, #tpu.memory_space<vmem>>, vector<2x128xf32>,
    %59 = arith.mulf %20, %37 : vector<2x128xf32>
    %60 = math.log %59 : vector<2x128xf32>
    %c14 = arith.constant 14 : index
    %c0_15 = arith.constant 0 : index
    %61 = vector.load %arg7[%c14, %c0_15] : memref<32x128xf32, #tpu.memory_space<vmem>>, vector<2x128xf32>
    tpu.vector_store %arg7[%c14, %c0_15], %60 {strides = array<i32>} : memref<32x128xf32, #tpu.memory_space<vmem>>, vector<2x128xf32>,
    %62 = arith.subf %36, %23 : vector<2x128xf32>
    %63 = arith.mulf %62, %24 : vector<2x128xf32>
    %c16 = arith.constant 16 : index
    %c0_16 = arith.constant 0 : index
    %64 = vector.load %arg7[%c16, %c0_16] : memref<32x128xf32, #tpu.memory_space<vmem>>, vector<2x128xf32>
    tpu.vector_store %arg7[%c16, %c0_16], %63 {strides = array<i32>} : memref<32x128xf32, #tpu.memory_space<vmem>>, vector<2x128xf32>,
    %65 = tpu.reciprocal %6 {approx = true} : vector<2x128xf32> -> vector<2x128xf32>
    %66 = vector.extract_strided_slice %65 {offsets = [0, 0], sizes = [1, 128], strides = [1, 1]} : vector<2x128xf32> to vector<1x128xf32>
    %67 = vector.extract_strided_slice %65 {offsets = [1, 0], sizes = [1, 128], strides = [1, 1]} : vector<2x128xf32> to vector<1x128xf32>
    %68 = arith.mulf %66, %67 : vector<1x128xf32>
    %69 = vector.extract_strided_slice %4 {offsets = [0, 0], sizes = [2, 128], strides = [1, 1]} : vector<4x128xf32> to vector<2x128xf32>
    %70 = arith.mulf %69, %65 : vector<2x128xf32>
    %c18 = arith.constant 18 : index
    %c0_17 = arith.constant 0 : index
    %71 = vector.load %arg7[%c18, %c0_17] : memref<32x128xf32, #tpu.memory_space<vmem>>, vector<2x128xf32>
    tpu.vector_store %arg7[%c18, %c0_17], %70 {strides = array<i32>} : memref<32x128xf32, #tpu.memory_space<vmem>>, vector<2x128xf32>,
    %72 = vector.extract_strided_slice %4 {offsets = [2, 0], sizes = [2, 128], strides = [1, 1]} : vector<4x128xf32> to vector<2x128xf32>
    %73 = arith.mulf %72, %65 : vector<2x128xf32>
    %c20 = arith.constant 20 : index
    %c0_18 = arith.constant 0 : index
    %74 = vector.load %arg7[%c20, %c0_18] : memref<32x128xf32, #tpu.memory_space<vmem>>, vector<2x128xf32>
    tpu.vector_store %arg7[%c20, %c0_18], %73 {strides = array<i32>} : memref<32x128xf32, #tpu.memory_space<vmem>>, vector<2x128xf32>,
    %75 = vector.extract_strided_slice %11 {offsets = [0, 0], sizes = [1, 128], strides = [1, 1]} : vector<2x128xf32> to vector<1x128xf32>
    %76 = vector.extract_strided_slice %11 {offsets = [1, 0], sizes = [1, 128], strides = [1, 1]} : vector<2x128xf32> to vector<1x128xf32>
    %77 = arith.mulf %75, %76 : vector<1x128xf32>
    %78 = arith.mulf %77, %68 : vector<1x128xf32>
    %c22 = arith.constant 22 : index
    %c0_19 = arith.constant 0 : index
    %79 = vector.load %arg7[%c22, %c0_19] : memref<32x128xf32, #tpu.memory_space<vmem>>, vector<1x128xf32>
    tpu.vector_store %arg7[%c22, %c0_19], %78 {strides = array<i32>} : memref<32x128xf32, #tpu.memory_space<vmem>>, vector<1x128xf32>,
    %80 = vector.extract_strided_slice %5 {offsets = [0, 0], sizes = [2, 128], strides = [1, 1]} : vector<4x128xf32> to vector<2x128xf32>
    %81 = arith.mulf %80, %65 : vector<2x128xf32>
    %c23 = arith.constant 23 : index
    %c0_20 = arith.constant 0 : index
    %82 = vector.load %arg7[%c23, %c0_20] : memref<32x128xf32, #tpu.memory_space<vmem>>, vector<2x128xf32>
    tpu.vector_store %arg7[%c23, %c0_20], %81 {strides = array<i32>} : memref<32x128xf32, #tpu.memory_space<vmem>>, vector<2x128xf32>,
    %83 = vector.extract_strided_slice %5 {offsets = [2, 0], sizes = [2, 128], strides = [1, 1]} : vector<4x128xf32> to vector<2x128xf32>
    %84 = arith.mulf %83, %65 : vector<2x128xf32>
    %c25 = arith.constant 25 : index
    %c0_21 = arith.constant 0 : index
    %85 = vector.load %arg7[%c25, %c0_21] : memref<32x128xf32, #tpu.memory_space<vmem>>, vector<2x128xf32>
    tpu.vector_store %arg7[%c25, %c0_21], %84 {strides = array<i32>} : memref<32x128xf32, #tpu.memory_space<vmem>>, vector<2x128xf32>,
    %86 = vector.extract_strided_slice %20 {offsets = [0, 0], sizes = [1, 128], strides = [1, 1]} : vector<2x128xf32> to vector<1x128xf32>
    %87 = vector.extract_strided_slice %20 {offsets = [1, 0], sizes = [1, 128], strides = [1, 1]} : vector<2x128xf32> to vector<1x128xf32>
    %88 = arith.mulf %86, %87 : vector<1x128xf32>
    %89 = arith.mulf %88, %68 : vector<1x128xf32>
    %c27 = arith.constant 27 : index
    %c0_22 = arith.constant 0 : index
    %90 = vector.load %arg7[%c27, %c0_22] : memref<32x128xf32, #tpu.memory_space<vmem>>, vector<1x128xf32>
    tpu.vector_store %arg7[%c27, %c0_22], %89 {strides = array<i32>} : memref<32x128xf32, #tpu.memory_space<vmem>>, vector<1x128xf32>,
    %c0_23 = arith.constant 0 : index
    %c0_24 = arith.constant 0 : index
    %91 = vector.load %arg7[%c0_23, %c0_24] : memref<32x128xf32, #tpu.memory_space<vmem>>, vector<32x128xf32>
    %c0_25 = arith.constant 0 : index
    %c0_26 = arith.constant 0 : index
    %92 = vector.load %arg2[%c0_25, %c0_26] : memref<64x32xf32, #tpu.memory_space<vmem>>, vector<64x32xf32>
    %cst_27 = arith.constant dense<0.000000e+00> : vector<64x128xf32>
    %93 = tpu.matmul %92, %91, %cst_27 {dimension_numbers = #tpu.dot_dimension_numbers<[1], [0], [0], [1], [0, 0, 1, 1], [], []>} : vector<64x32xf32>, vector<32x128xf32>, vector<64x128xf32> -> vector<64x128xf32>
    %c0_28 = arith.constant 0 : index
    %c0_29 = arith.constant 0 : index
    %94 = vector.load %arg3[%c0_28, %c0_29] : memref<64x1xf32, #tpu.memory_space<vmem>>, vector<64x1xf32>
    %95 = vector.broadcast %94 : vector<64x1xf32> to vector<64x128xf32>
    %96 = arith.addf %93, %95 : vector<64x128xf32>
    %cst_30 = arith.constant 0.000000e+00 : f32
    %97 = vector.broadcast %cst_30 : f32 to vector<64x128xf32>
    %98 = arith.cmpf oge, %96, %97 : vector<64x128xf32>
    %cst_31 = arith.constant 1.000000e-01 : f32
    %99 = vector.broadcast %cst_31 : f32 to vector<64x128xf32>
    %100 = arith.mulf %99, %96 : vector<64x128xf32>
    %101 = arith.select %98, %96, %100 : vector<64x128xi1>, vector<64x128xf32>
    %c0_32 = arith.constant 0 : index
    %c0_33 = arith.constant 0 : index
    %102 = vector.load %arg4[%c0_32, %c0_33] : memref<64x64xf32, #tpu.memory_space<vmem>>, vector<64x64xf32>
    %cst_34 = arith.constant dense<0.000000e+00> : vector<64x128xf32>
    %103 = tpu.matmul %102, %101, %cst_34 {dimension_numbers = #tpu.dot_dimension_numbers<[1], [0], [0], [1], [0, 0, 1, 1], [], []>} : vector<64x64xf32>, vector<64x128xf32>, vector<64x128xf32> -> vector<64x128xf32>
    %c0_35 = arith.constant 0 : index
    %c0_36 = arith.constant 0 : index
    %104 = vector.load %arg5[%c0_35, %c0_36] : memref<64x1xf32, #tpu.memory_space<vmem>>, vector<64x1xf32>
    %105 = vector.broadcast %104 : vector<64x1xf32> to vector<64x128xf32>
    %106 = arith.addf %103, %105 : vector<64x128xf32>
    %cst_37 = arith.constant 0.000000e+00 : f32
    %107 = vector.broadcast %cst_37 : f32 to vector<64x128xf32>
    %108 = arith.cmpf oge, %106, %107 : vector<64x128xf32>
    %cst_38 = arith.constant 1.000000e-01 : f32
    %109 = vector.broadcast %cst_38 : f32 to vector<64x128xf32>
    %110 = arith.mulf %109, %106 : vector<64x128xf32>
    %111 = arith.select %108, %106, %110 : vector<64x128xi1>, vector<64x128xf32>
    %c0_39 = arith.constant 0 : index
    %c0_40 = arith.constant 0 : index
    %112 = vector.load %arg6[%c0_39, %c0_40] : memref<64x128xf32, #tpu.memory_space<vmem>>, vector<64x128xf32>
    tpu.vector_store %arg6[%c0_39, %c0_40], %111 {strides = array<i32>} : memref<64x128xf32, #tpu.memory_space<vmem>>, vector<64x128xf32>,
    return
  }
  func.func @transform_0(%arg0: i32) -> (i32, i32) {
    %c0_i32 = arith.constant 0 : i32
    %c0_i32_0 = arith.constant 0 : i32
    return %c0_i32, %arg0 : i32, i32
  }
  func.func @transform_1(%arg0: i32) -> (i32, i32) {
    %c0_i32 = arith.constant 0 : i32
    %c0_i32_0 = arith.constant 0 : i32
    %c0_i32_1 = arith.constant 0 : i32
    return %c0_i32, %c0_i32_0 : i32, i32
  }
  func.func @transform_2(%arg0: i32) -> (i32, i32) {
    %c0_i32 = arith.constant 0 : i32
    %c0_i32_0 = arith.constant 0 : i32
    %c0_i32_1 = arith.constant 0 : i32
    return %c0_i32, %c0_i32_0 : i32, i32
  }
  func.func @transform_3(%arg0: i32) -> (i32, i32) {
    %c0_i32 = arith.constant 0 : i32
    %c0_i32_0 = arith.constant 0 : i32
    %c0_i32_1 = arith.constant 0 : i32
    return %c0_i32, %c0_i32_0 : i32, i32
  }
  func.func @transform_4(%arg0: i32) -> (i32, i32) {
    %c0_i32 = arith.constant 0 : i32
    %c0_i32_0 = arith.constant 0 : i32
    %c0_i32_1 = arith.constant 0 : i32
    return %c0_i32, %c0_i32_0 : i32, i32
  }
  func.func @transform_5(%arg0: i32) -> (i32, i32) {
    %c0_i32 = arith.constant 0 : i32
    %c0_i32_0 = arith.constant 0 : i32
    return %c0_i32, %arg0 : i32, i32
  }
}

</mosaic_0001>

<bundles_post_ra>
// kernel: _spatial_mlp_call.1
= control target key start
LH: loop header
LB: loop body
LE: loop exit
PB: predicated region body
PF: predicated region fallthrough
CT: control target
= control target key end

     0   :  { %v533_v3 = vmov 0   ;;  %v534_v4 = vmov 0.0   ;;  %s697_s0 = inlined_call_operand.vmem [shape: f32[10,128], index: 0, kind: input, shape index: {}]   ;;  %s698_s1 = inlined_call_operand.vmem [shape: f32[64,32], index: 1, kind: input, shape index: {}]   ;;  %s699_s2 = inlined_call_operand.vmem [shape: f32[64,1], index: 2, kind: input, shape index: {}]   ;;  %s700_s3 = inlined_call_operand.vmem [shape: f32[64,64], index: 3, kind: input, shape index: {}]   ;;  %s701_s4 = inlined_call_operand.vmem [shape: f32[64,1], index: 4, kind: input, shape index: {}]   ;;  %s702_s5 = inlined_call_operand.hbm [shape: f32[64,128], index: 5, kind: output, shape index: {}]  }
   0x1   :  { %v156_v0 = vld [vmem:[%s699_s2 + $0x38] sm:$0xff]  ;;  %v29_v1 = vld [vmem:[%s697_s0] sm:$0xff]  ;;  %v30_v2 = vld [vmem:[%s697_s0 + $0x8] sm:$0x3]  ;;  %492 = vset.pattern.permute.xlu0 %v533_v3  ;;  %27 = vst [vmem:[#allocation2 + $0x10] sm:$0xff] %v534_v4  ;;  %493 = vset.pattern.permute.xlu1 %v533_v3 }
   0x2   :  { %v32_v5 = vrot.slane %v29_v1, 6  ;;  %495 = vrcp.f32 %v30_v2  ;;  %v154_v6 = vld [vmem:[%s699_s2 + $0x28] sm:$0xff]  ;;  %v42_v7 = vrot.slane %v29_v1, 4 }
   0x3   :  { %10 = vsyncpa [#allocation4], 0  ;;  %194 = vperm.xlu0 %492, %v156_v0   ;;  %28 = vst [vmem:[#allocation2 + $0x18] sm:$0xff] %v534_v4  ;;  %184 = vperm.xlu1 %493, %v154_v6   ;;  %v155_v17 = vld [vmem:[%s699_s2 + $0x30] sm:$0xff]  ;;  %v153_v29 = vld [vmem:[%s699_s2 + $0x20] sm:$0xff]  ;;  %vm197_vm0 = vcmask 261120  }
   0x4   :  { %v34_v8 = vsub.f32 %v29_v1, %v32_v5  ;;  %25 = vst [vmem:[#allocation2] sm:$0xff] %v534_v4  ;;  %v44_v9 = vmin.f32 %v29_v1, %v42_v7  ;;  %v45_v10 = vmax.f32 %v29_v1, %v42_v7  ;;  %494 = vset.pattern.permute.xlu2 %v533_v3  ;;  %v150_v45 = vld [vmem:[%s699_s2 + $0x8] sm:$0xff]  ;;  %v149_v56 = vld [vmem:[%s699_s2] sm:$0xff]  ;;  %vm343_vm9 = vcmask 523264   ;;  %s447_s7 = sshll.u32 %s702_s5, 4  ;;  %s536_s8 = smov 128   ;;  %s448_s7 = int_to_ptr.hbm [resolvable:$true] %s447_s7 }
   0x5   :  { %26 = vst [vmem:[#allocation2 + $0x8] sm:$0xff] %v534_v4  ;;  %v296_v3 = vld [vmem:[%s701_s4 + $0x8] sm:$0xff]  ;;  %s537_s9 = smov 8  }
   0x6   :  { %v580_v11 = vadd.f32 1.0, %v34_v8  ;;  %v47_v12 = vrot.slane %v44_v9, 6 }
   0x8   :  { %v496_v13 = vpop.eup %495  ;;  %v117_v14 = vrot.slane %v580_v11, 1  ;;  %v36_v15 = vmul.f32 0.5, %v580_v11  ;;  %497 = vrcp.f32 %v580_v11  ;;  %v49_v16 = vsub.f32 %v45_v10, %v47_v12  ;;  %v297_v10 = vld [vmem:[%s701_s4 + $0x10] sm:$0xff] }
   0x9   :  { %v107_v18 = vrot.slane %v496_v13, 1  ;;  %v125_v19 = vrot.slane %v496_v13, 4  ;;  %v129_v20 = vrot.slane %v496_v13, 2  ;;  %v110_v21 = vmul.f32 %v496_v13, %v29_v1 }
   0xa   :  { %v119_v22 = vmul.f32 %v117_v14, %v580_v11  ;;  %v38_v23 = vrot.slane %v36_v15, 2  ;;  %v50_v24 = vadd.f32 1.0, %v49_v16  ;;  %v112_v25 = vrot.slane %v496_v13, 6  ;;  %v141_v14 = vld [vmem:[%s698_s1] sm:$0xff]  ;;  %v146_v15 = vld [vmem:[%s698_s1 + $0x28] sm:$0xff]  ;;  %v302_v16 = vld [vmem:[%s701_s4 + $0x38] sm:$0xff] }
   0xb   :  { %v109_v26 = vmul.f32 %v496_v13, %v107_v18  ;;  %v127_v27 = vmul.f32 %v125_v19, %v29_v1  ;;  %v131_v28 = vmul.f32 %v129_v20, %v29_v1  ;;  %111 = vst [vmem:[#allocation2 + $0x12] sm:$0x3] %v110_v21  ;;  %189 = vperm.xlu0 %492, %v155_v17   ;;  %v300_v17 = vld [vmem:[%s701_s4 + $0x28] sm:$0xff]  ;;  %v151_v18 = vld [vmem:[%s699_s2 + $0x10] sm:$0xff]  ;;  %v295_v21 = vld [vmem:[%s701_s4] sm:$0xff] }
   0xc   :  { %v40_v30 = vadd.f32 %v38_v23, %v29_v1  ;;  %v51_v31 = vmul.f32 0.5, %v50_v24  ;;  %v114_v32 = vmul.f32 %v112_v25, %v29_v1  ;;  %499 = vrcp.f32 %v50_v24  ;;  %179 = vperm.xlu1 %493, %v153_v29   ;;  %v142_v19 = vld [vmem:[%s698_s1 + $0x8] sm:$0xff]  ;;  %v147_v20 = vld [vmem:[%s698_s1 + $0x30] sm:$0xff]  ;;  %v148_v23 = vld [vmem:[%s698_s1 + $0x38] sm:$0xff] }
   0xd   :  { %128 = vst [vmem:[#allocation2 + $0x13] sm:$0x30] %v127_v27  ;;  %v133_v33 = vrot.slane %v109_v26, 2  ;;  %v121_v34 = vrot.slane %v109_v26, 6  ;;  %v144_v25 = vld [vmem:[%s698_s1 + $0x18] sm:$0xff]  ;;  %v301_v26 = vld [vmem:[%s701_s4 + $0x30] sm:$0xff] }
   0xe   :  { %v498_v35 = vpop.eup %497  ;;  %132 = vst [vmem:[#allocation2 + $0x13] sm:$0xc0] %v131_v28  ;;  %v53_v36 = vrot.slane %v51_v31, 2  ;;  %v58_v37 = vrot.slane %v40_v30, 4  ;;  %v145_v27 = vld [vmem:[%s698_s1 + $0x20] sm:$0xff] }
   0xf   :  { %v135_v38 = vmul.f32 %v133_v33, %v119_v22  ;;  %115 = vst [vmem:[#allocation2 + $0x12] sm:$0xc] %v114_v32  ;;  %v123_v39 = vmul.f32 %v121_v34, %v119_v22  ;;  %v78_v40 = vmul.f32 %v498_v35, %v50_v24  ;;  %v62_v42 = vrot.slane %v498_v35, 6  ;;  %v143_v22 = vld [vmem:[%s698_s1 + $0x10] sm:$0xff]  ;;  %v298_v24 = vld [vmem:[%s701_s4 + $0x18] sm:$0xff] }
  0x10   :  { %v55_v41 = vadd.f32 %v53_v36, %v44_v9  ;;  %v60_v43 = vsub.f32 %v40_v30, %v58_v37  ;;  %v66_v44 = vrot.slane %v498_v35, 4  ;;  %v74_v46 = vrot.slane %v498_v35, 2  ;;  %v299_v9 = vld [vmem:[%s701_s4 + $0x20] sm:$0xff] }
  0x11   :  { %136 = vst [vmem:[#allocation2 + $0x15] sm:$0x40] %v135_v38  ;;  %501 = vlog2.f32 %v78_v40 }
  0x12   :  { %v500_v47 = vpop.eup %499  ;;  %v102_v48 = vsub.f32 %v55_v41, %v58_v37  ;;  %124 = vst [vmem:[#allocation2 + $0x14] sm:$0x4] %v123_v39  ;;  %v82_v49 = vsub.f32 %v40_v30, %v55_v41  ;;  %v89_v50 = vrot.slane %v55_v41, 4  ;;  %v64_v51 = vmul.f32 %v62_v42, %v60_v43 }
  0x13   :  { %v84_v52 = vrot.slane %v500_v47, 2  ;;  %v92_v53 = vrot.slane %v500_v47, 6  ;;  %v96_v54 = vrot.slane %v500_v47, 4  ;;  %v68_v55 = vmul.f32 %v66_v44, %v580_v11  ;;  %164 = vperm.xlu0 %492, %v150_v45  }
  0x14   :  { %v103_v57 = vmul.f32 %v102_v48, %v62_v42  ;;  %v91_v58 = vsub.f32 %v40_v30, %v89_v50  ;;  %65 = vst [vmem:[#allocation2 - $0x4] sm:$0x30] %v64_v51  ;;  %v73_v59 = vsub.f32 %v55_v41, %v40_v30  ;;  %159 = vperm.xlu1 %493, %v149_v56  }
  0x15   :  { %v86_v60 = vmul.f32 %v84_v52, %v82_v49  ;;  %v98_v61 = vmul.f32 %v96_v54, %v580_v11  ;;  %503 = vlog2.f32 %v68_v55  ;;  %72 = vst [vmem:[#allocation2 + $0x4] sm:$0x3] %v64_v51  ;;  %v152_v11 = vld [vmem:[%s699_s2 + $0x18] sm:$0xff] }
  0x16   :  { %104 = vst [vmem:[#allocation2 + $0x10] sm:$0x3] %v103_v57  ;;  %v94_v62 = vmul.f32 %v92_v53, %v91_v58  ;;  %v76_v63 = vmul.f32 %v74_v46, %v73_v59  ;;  %174 = vperm.xlu2 %494, %v152_v11   ;;  %v294_v11 = vld [vmem:[%s700_s3 + $0x38] sm:$0xff] }
  0x17   :  { %v502_v0 = vpop.eup %501  ;;  %87 = vst [vmem:[#allocation2 + $0xa] sm:$0x3] %v86_v60  ;;  %505 = vlog2.f32 %v98_v61 }
  0x18   :  { %v140_v1 = vld [vmem:[#allocation2 + $0x18] sm:$0xff]  ;;  %v80_v2 = vmul.f32 0.6931472, %v502_v0  ;;  %95 = vst [vmem:[#allocation2 + $0x8] sm:$0x30] %v94_v62 }
  0x19   :  { %234 = vmatpush.msra.mxu0 %v140_v1  ;;  %475 = vmatpush.msra.mxu3 %v140_v1  ;;  %77 = vst [vmem:[#allocation2 + $0x6] sm:$0x3] %v76_v63 }
  0x1a   :  { %81 = vst [vmem:[#allocation2 + $0x6] sm:$0xc] %v80_v2 }
  0x1b   :  { %v504_v4 = vpop.eup %503  ;;  %310 = vperm.xlu0 %492, %v296_v3   ;;  %v287_v3 = vld [vmem:[%s700_s3] sm:$0xff] }
  0x1c   :  { %v70_v5 = vmul.f32 0.6931472, %v504_v4  ;;  %315 = vperm.xlu1 %493, %v297_v10   ;;  %v291_v4 = vld [vmem:[%s700_s3 + $0x20] sm:$0xff]  ;;  %v290_v10 = vld [vmem:[%s700_s3 + $0x18] sm:$0xff] }
  0x1d   :  { %v506_v6 = vpop.eup %505  ;;  %v139_v7 = vld [vmem:[#allocation2 + $0x10] sm:$0xff] }
  0x1e   :  { %235 = vmatpush.msra.mxu0 %v139_v7  ;;  %476 = vmatpush.msra.mxu3 %v139_v7  ;;  %v100_v8 = vmul.f32 0.6931472, %v506_v6  ;;  %71 = vst [vmem:[#allocation2 - $0x4] sm:$0xc0] %v70_v5  ;;  %v288_v6 = vld [vmem:[%s700_s3 + $0x8] sm:$0xff] }
  0x1f   :  { %169 = vperm.xlu2 %494, %v151_v18   ;;  %v292_v7 = vld [vmem:[%s700_s3 + $0x28] sm:$0xff] }
  0x20   :  { %101 = vst [vmem:[#allocation2 + $0x8] sm:$0xc0] %v100_v8  ;;  %v289_v8 = vld [vmem:[%s700_s3 + $0x10] sm:$0xff] }
  0x23   :  { %325 = vperm.xlu0 %492, %v299_v9   ;;  %v293_v9 = vld [vmem:[%s700_s3 + $0x30] sm:$0xff]  ;;  %s535_s3 = smov [#allocation3]  }
  0x24   :  { %330 = vperm.xlu1 %493, %v300_v17   ;;  %s445_s30 = sshll.u32 %s535_s3, 4  ;;  %s446_s30 = int_to_ptr.vmem [resolvable:$true] %s445_s30 }
  0x25   :  { %v137_v13 = vld [vmem:[#allocation2] sm:$0xff] }
  0x27   :  { %v138_v12 = vld [vmem:[#allocation2 + $0x8] sm:$0xff]  ;;  %305 = vperm.xlu2 %494, %v295_v21  }
  0x28   :  { %236 = vmatpush.msra.mxu0 %v138_v12  ;;  %477 = vmatpush.msra.mxu3 %v138_v12 }
  0x2a   :  { %237 = vmatpush.msra.mxu0 %v137_v13  ;;  %478 = vmatpush.msra.mxu3 %v137_v13 }
  0x2b   :  { %459 = vmatmul.msk.f32.vlgmr.msra.gmra.mxu0 %vm197_vm0, %v141_v14  ;;  %464 = vmatmul.msk.f32.vlgmr.msra.gmra.mxu3 %vm197_vm0, %v146_v15 }
  0x2c   :  { %340 = vperm.xlu0 %492, %v302_v16  }
  0x2f   :  { %320 = vperm.xlu2 %494, %v298_v24  }
  0x33   :  { %460 = vmatmul.msk.f32.gmra.mxu0 %vm197_vm0, %v142_v19  ;;  %465 = vmatmul.msk.f32.gmra.mxu3 %vm197_vm0, %v147_v20 }
  0x37   :  { %335 = vperm.xlu2 %494, %v301_v26  }
  0x3b   :  { %461 = vmatmul.msk.f32.gmra.mxu0 %vm197_vm0, %v143_v22  ;;  %466 = vmatmul.msk.f32.gmra.mxu3 %vm197_vm0, %v148_v23 }
  0x43   :  { %462 = vmatmul.msk.f32.gmra.mxu0 %vm197_vm0, %v144_v25 }
  0x4b   :  { %463 = vmatmul.msk.f32.gmra.mxu0 %vm197_vm0, %v145_v27 }
  0x70   :  { %v175_v37 = vpop.permute.xlu2 %174 }
  0x75   :  { %v195_v31 = vpop.permute.xlu0 %194  ;;  %v185_v32 = vpop.permute.xlu1 %184 }
  0x79   :  { %v170_v50 = vpop.permute.xlu2 %169 }
  0x7d   :  { %v190_v35 = vpop.permute.xlu0 %189 }
  0x7e   :  { %v180_v41 = vpop.permute.xlu1 %179 }
  0x81   :  { %v306_v13 = vpop.permute.xlu2 %305 }
  0x85   :  { %v165_v54 = vpop.permute.xlu0 %164 }
  0x86   :  { %v160_v55 = vpop.permute.xlu1 %159 }
  0x89   :  { %v321_v27 = vpop.permute.xlu2 %320 }
  0x8d   :  { %v311_v12 = vpop.permute.xlu0 %310 }
  0x8e   :  { %v316_v17 = vpop.permute.xlu1 %315 }
  0x95   :  { %v326_v19 = vpop.permute.xlu0 %325 }
  0xa8   :  { %v239_v28 = vpop.f32.mrf.mxu0 }
  0xa9   :  { %v240_v59 = vadd.f32 %v239_v28, %v160_v55 }
  0xab   :  { %v271_v1 = vmul.f32 0.1, %v240_v59  ;;  %vm263_vm8 = vcmp.ge.f32.partialorder %v240_v59, 0.0 }
  0xad   :  { %v279_v5 = vsel %vm263_vm8, %v240_v59, %v271_v1 }
  0xae   :  { %v254_v29 = vpop.f32.mrf.mxu3 }
  0xaf   :  { %v255_v39 = vadd.f32 %v254_v29, %v185_v32  ;;  %v331_v29 = vpop.permute.xlu1 %330 }
  0xb0   :  { %v242_v30 = vpop.f32.mrf.mxu0 }
  0xb1   :  { %v276_v46 = vmul.f32 0.1, %v255_v39  ;;  %vm268_vm3 = vcmp.ge.f32.partialorder %v255_v39, 0.0  ;;  %v243_v56 = vadd.f32 %v242_v30, %v165_v54 }
  0xb3   :  { %v284_v49 = vsel %vm268_vm3, %v255_v39, %v276_v46  ;;  %v272_v63 = vmul.f32 0.1, %v243_v56  ;;  %vm264_vm7 = vcmp.ge.f32.partialorder %v243_v56, 0.0 }
  0xb5   :  { %v280_v2 = vsel %vm264_vm7, %v243_v56, %v272_v63 }
  0xb6   :  { %v257_v33 = vpop.f32.mrf.mxu3 }
  0xb7   :  { %v258_v36 = vadd.f32 %v257_v33, %v190_v35 }
  0xb8   :  { %v245_v34 = vpop.f32.mrf.mxu0 }
  0xb9   :  { %v277_v44 = vmul.f32 0.1, %v258_v36  ;;  %vm269_vm2 = vcmp.ge.f32.partialorder %v258_v36, 0.0  ;;  %v246_v52 = vadd.f32 %v245_v34, %v170_v50 }
  0xbb   :  { %v285_v47 = vsel %vm269_vm2, %v258_v36, %v277_v44  ;;  %v273_v61 = vmul.f32 0.1, %v246_v52  ;;  %vm265_vm6 = vcmp.ge.f32.partialorder %v246_v52, 0.0 }
  0xbd   :  { %v281_v0 = vsel %vm265_vm6, %v246_v52, %v273_v61 }
  0xbe   :  { %v260_v38 = vpop.f32.mrf.mxu3 }
  0xbf   :  { %v261_v40 = vadd.f32 %v260_v38, %v195_v31  ;;  %v336_v38 = vpop.permute.xlu2 %335 }
  0xc0   :  { %v248_v42 = vpop.f32.mrf.mxu0 }
  0xc1   :  { %vm270_vm1 = vcmp.ge.f32.partialorder %v261_v40, 0.0  ;;  %v278_v43 = vmul.f32 0.1, %v261_v40  ;;  %v249_v48 = vadd.f32 %v248_v42, %v175_v37 }
  0xc3   :  { %v286_v45 = vsel %vm270_vm1, %v261_v40, %v278_v43  ;;  %v274_v58 = vmul.f32 0.1, %v249_v48  ;;  %vm266_vm5 = vcmp.ge.f32.partialorder %v249_v48, 0.0 }
  0xc4   :  { %376 = vmatpush.msra.mxu1 %v286_v45  ;;  %479 = vmatpush.msra.mxu2 %v286_v45 }
  0xc5   :  { %v282_v62 = vsel %vm266_vm5, %v249_v48, %v274_v58 }
  0xc6   :  { %377 = vmatpush.msra.mxu1 %v285_v47  ;;  %480 = vmatpush.msra.mxu2 %v285_v47  ;;  %v341_v47 = vpop.permute.xlu0 %340 }
  0xc8   :  { %v251_v51 = vpop.f32.mrf.mxu0  ;;  %378 = vmatpush.msra.mxu1 %v284_v49  ;;  %481 = vmatpush.msra.mxu2 %v284_v49 }
  0xc9   :  { %v252_v53 = vadd.f32 %v251_v51, %v180_v41 }
  0xcb   :  { %vm267_vm4 = vcmp.ge.f32.partialorder %v252_v53, 0.0  ;;  %v275_v57 = vmul.f32 0.1, %v252_v53 }
  0xcd   :  { %v283_v60 = vsel %vm267_vm4, %v252_v53, %v275_v57 }
  0xce   :  { %379 = vmatpush.msra.mxu1 %v283_v60  ;;  %482 = vmatpush.msra.mxu2 %v283_v60 }
  0xd0   :  { %380 = vmatpush.msra.mxu1 %v282_v62  ;;  %483 = vmatpush.msra.mxu2 %v282_v62 }
  0xd2   :  { %381 = vmatpush.msra.mxu1 %v281_v0  ;;  %484 = vmatpush.msra.mxu2 %v281_v0 }
  0xd4   :  { %382 = vmatpush.msra.mxu1 %v280_v2  ;;  %485 = vmatpush.msra.mxu2 %v280_v2 }
  0xd6   :  { %383 = vmatpush.msra.mxu1 %v279_v5  ;;  %486 = vmatpush.msra.mxu2 %v279_v5 }
  0xd7   :  { %467 = vmatmul.msk.f32.vlgmr.msra.gmra.mxu1 %vm343_vm9, %v287_v3  ;;  %471 = vmatmul.msk.f32.vlgmr.msra.gmra.mxu2 %vm343_vm9, %v291_v4 }
  0xdf   :  { %468 = vmatmul.msk.f32.gmra.mxu1 %vm343_vm9, %v288_v6  ;;  %472 = vmatmul.msk.f32.gmra.mxu2 %vm343_vm9, %v292_v7 }
  0xe7   :  { %469 = vmatmul.msk.f32.gmra.mxu1 %vm343_vm9, %v289_v8  ;;  %473 = vmatmul.msk.f32.gmra.mxu2 %vm343_vm9, %v293_v9 }
  0xef   :  { %470 = vmatmul.msk.f32.gmra.mxu1 %vm343_vm9, %v290_v10  ;;  %474 = vmatmul.msk.f32.gmra.mxu2 %vm343_vm9, %v294_v11 }
 0x154   :  { %v385_v14 = vpop.f32.mrf.mxu1 }
 0x155   :  { %v386_v15 = vadd.f32 %v385_v14, %v306_v13 }
 0x157   :  { %vm409_vm10 = vcmp.ge.f32.partialorder %v386_v15, 0.0  ;;  %v417_v16 = vmul.f32 0.1, %v386_v15 }
 0x159   :  { %v425_v18 = vsel %vm409_vm10, %v386_v15, %v417_v16 }
 0x15a   :  { %433 = vst [vmem:[#allocation3] sm:$0xff] %v425_v18  ;;  %v397_v20 = vpop.f32.mrf.mxu2 }
 0x15b   :  { %v398_v21 = vadd.f32 %v397_v20, %v326_v19 }
 0x15c   :  { %v388_v22 = vpop.f32.mrf.mxu1 }
 0x15d   :  { %vm413_vm11 = vcmp.ge.f32.partialorder %v398_v21, 0.0  ;;  %v421_v23 = vmul.f32 0.1, %v398_v21  ;;  %v389_v24 = vadd.f32 %v388_v22, %v311_v12 }
 0x15f   :  { %v429_v25 = vsel %vm413_vm11, %v398_v21, %v421_v23  ;;  %vm410_vm12 = vcmp.ge.f32.partialorder %v389_v24, 0.0  ;;  %v418_v26 = vmul.f32 0.1, %v389_v24 }
 0x160   :  { %437 = vst [vmem:[#allocation3 + $0x20] sm:$0xff] %v429_v25 }
 0x161   :  { %v426_v28 = vsel %vm410_vm12, %v389_v24, %v418_v26 }
 0x162   :  { %434 = vst [vmem:[#allocation3 + $0x8] sm:$0xff] %v426_v28  ;;  %v400_v30 = vpop.f32.mrf.mxu2 }
 0x163   :  { %v401_v31 = vadd.f32 %v400_v30, %v331_v29 }
 0x164   :  { %v391_v32 = vpop.f32.mrf.mxu1 }
 0x165   :  { %vm414_vm13 = vcmp.ge.f32.partialorder %v401_v31, 0.0  ;;  %v422_v33 = vmul.f32 0.1, %v401_v31  ;;  %v392_v34 = vadd.f32 %v391_v32, %v316_v17 }
 0x167   :  { %v430_v35 = vsel %vm414_vm13, %v401_v31, %v422_v33  ;;  %vm411_vm14 = vcmp.ge.f32.partialorder %v392_v34, 0.0  ;;  %v419_v36 = vmul.f32 0.1, %v392_v34 }
 0x168   :  { %438 = vst [vmem:[#allocation3 + $0x28] sm:$0xff] %v430_v35 }
 0x169   :  { %v427_v37 = vsel %vm411_vm14, %v392_v34, %v419_v36 }
 0x16a   :  { %435 = vst [vmem:[#allocation3 + $0x10] sm:$0xff] %v427_v37  ;;  %v403_v39 = vpop.f32.mrf.mxu2 }
 0x16b   :  { %v404_v40 = vadd.f32 %v403_v39, %v336_v38 }
 0x16c   :  { %v394_v41 = vpop.f32.mrf.mxu1 }
 0x16d   :  { %vm415_vm15 = vcmp.ge.f32.partialorder %v404_v40, 0.0  ;;  %v423_v42 = vmul.f32 0.1, %v404_v40  ;;  %v395_v43 = vadd.f32 %v394_v41, %v321_v27 }
 0x16f   :  { %v431_v44 = vsel %vm415_vm15, %v404_v40, %v423_v42  ;;  %vm412_vm0 = vcmp.ge.f32.partialorder %v395_v43, 0.0  ;;  %v420_v45 = vmul.f32 0.1, %v395_v43 }
 0x170   :  { %439 = vst [vmem:[#allocation3 + $0x30] sm:$0xff] %v431_v44 }
 0x171   :  { %v428_v46 = vsel %vm412_vm0, %v395_v43, %v420_v45 }
 0x172   :  { %436 = vst [vmem:[#allocation3 + $0x18] sm:$0xff] %v428_v46  ;;  %v406_v48 = vpop.f32.mrf.mxu2 }
 0x173   :  { %v407_v49 = vadd.f32 %v406_v48, %v341_v47 }
 0x175   :  { %vm416_vm1 = vcmp.ge.f32.partialorder %v407_v49, 0.0  ;;  %v424_v50 = vmul.f32 0.1, %v407_v49 }
 0x177   :  { %v432_v51 = vsel %vm416_vm1, %v407_v49, %v424_v50 }
 0x178   :  { %440 = vst [vmem:[#allocation3 + $0x38] sm:$0xff] %v432_v51 }
 0x179   :  { %453 = dma.vmem_to_hbm [thread:$0]  %s446_s30, 1024, %s448_s7, [#allocation4], %s536_s8, %s536_s8, %s537_s9  }
 0x17a   :  { %531 = dma.done.wait [#allocation4], 1024  }
 0x17b   :  { %532 = vsyncadd [#allocation4], 4294966272 }
 0x17c   :  { %458 = vsyncpa [#allocation4], 1 }

</bundles_post_ra>
